<compile_context>
chip_gen: v7x
topology: tpu7x:2x2x1
jax: 0.10.0
libtpu: 0.0.40
codegen_flags: <defaults>
</compile_context>

<pallas_src>
import functools

import jax
import jax.numpy as jnp
from jax.experimental import pallas as pl
from jax.experimental.pallas import tpu as pltpu


def _round_up(n, m):
    return -(-n // m) * m


# ----------------------------------------------------------------------------
# Pallas kernel: fused Q1+Q2 MLP (transposed layout) + task contraction.
#   x_ref : (x_rows, tb)  f32   rows = [obs | action | pad | task | pad]
#   w_ref : (w_rows, C)   bf16  resident, 8-row-aligned sections, C % 128 == 0
#   b_ref : (b_rows, 8)   f32   resident, one bias vector per column
#   out   : (2, tb)       f32   row 0 = q1, row 1 = q2  (lane-dense)
# ----------------------------------------------------------------------------
def _critic_sf_fused_kernel(x_ref, w_ref, b_ref, out_ref, *,
                            inp, t_off, S, H2, S2, w_offs):
    f32, bf16 = jnp.float32, jnp.bfloat16

    xd = x_ref[0:inp, :]                      # (INP, tb) obs|act rows, f32
    t = x_ref[t_off:t_off + S, :]             # (S,  tb)  task rows,   f32

    o1, o2, o3, o4 = w_offs                   # static, 8-aligned row offsets
    w1 = w_ref[o1:o1 + H2, 0:inp]             # (2H, INP) fused layer 1
    w2 = w_ref[o2:o2 + H2, 0:H2]              # (2H, 2H)  block-diagonal
    w3 = w_ref[o3:o3 + H2, 0:H2]              # (2H, 2H)  block-diagonal
    w4 = w_ref[o4:o4 + S2, 0:H2]              # (2S, 2H)  block-diagonal

    b1 = b_ref[0:H2, 0:1]                     # column biases, f32
    b2 = b_ref[0:H2, 1:2]
    b3 = b_ref[0:H2, 2:3]
    b4 = b_ref[0:S2, 3:4]

    # bf16 only at the MXU operands; accumulate, bias, ReLU, contraction in f32.
    h = jnp.maximum(
        jnp.dot(w1, xd.astype(bf16), preferred_element_type=f32) + b1, 0.0)
    h = jnp.maximum(
        jnp.dot(w2, h.astype(bf16), preferred_element_type=f32) + b2, 0.0)
    h = jnp.maximum(
        jnp.dot(w3, h.astype(bf16), preferred_element_type=f32) + b3, 0.0)
    y = jnp.dot(w4, h.astype(bf16), preferred_element_type=f32) + b4  # (2S, tb)

    # einsum('bi,bi->b', task, q_k): aligned sublane slices + sublane reduce.
    q1 = jnp.sum(t * y[0:S, :], axis=0, keepdims=True)       # (1, tb)
    q2 = jnp.sum(t * y[S:S2, :], axis=0, keepdims=True)      # (1, tb)
    out_ref[...] = jnp.concatenate([q1, q2], axis=0).astype(out_ref.dtype)


# ----------------------------------------------------------------------------
# Parameter init (stand-in for utils.weight_init) + one-time packing.
# Weights are stored PyTorch-style (out_features, in_features).
# ----------------------------------------------------------------------------
def init_params(key, obs_dim, action_dim, hidden_dim, sf_dim):
    in_dim = obs_dim + action_dim

    def linear(k, d_in, d_out):
        kw, kb = jax.random.split(k)
        bound = 1.0 / jnp.sqrt(jnp.float32(d_in))
        w = jax.random.uniform(kw, (d_out, d_in), jnp.float32, -bound, bound)
        b = jax.random.uniform(kb, (d_out,), jnp.float32, -bound, bound)
        return w, b

    def branch(k):
        k1, k2, k3, k4 = jax.random.split(k, 4)
        return (linear(k1, in_dim, hidden_dim),
                linear(k2, hidden_dim, hidden_dim),
                linear(k3, hidden_dim, hidden_dim),
                linear(k4, hidden_dim, sf_dim))

    kq1, kq2 = jax.random.split(key)
    return branch(kq1), branch(kq2)


def pack_params(q1_params, q2_params, obs_dim, action_dim, hidden_dim, sf_dim,
                w_dtype=jnp.bfloat16):
    """Fuse Q1/Q2 (block-diagonal) and pack into two resident slabs."""
    H, S = hidden_dim, sf_dim
    H2, S2 = 2 * H, 2 * S
    in_dim = obs_dim + action_dim
    INP = _round_up(in_dim, 8)                 # obs|act rows (8-aligned)
    x_rows = INP + _round_up(S, 8)             # + task rows

    # Block-diag fusion doubles stored zeros; only a win while 2H fits the MXU
    # lane width.  For large hidden_dim revert to two (H,H) matmuls per layer.
    assert H2 <= 256, "revert Q1/Q2 block-diag fusion for this hidden_dim"

    def blkdiag(a, b):
        out = jnp.zeros((a.shape[0] + b.shape[0], a.shape[1] + b.shape[1]),
                        jnp.float32)
        out = out.at[:a.shape[0], :a.shape[1]].set(a)
        out = out.at[a.shape[0]:, a.shape[1]:].set(b)
        return out

    (w1a, b1a), (w2a, b2a), (w3a, b3a), (w4a, b4a) = q1_params
    (w1b, b1b), (w2b, b2b), (w3b, b3b), (w4b, b4b) = q2_params

    w1f = jnp.zeros((H2, INP), jnp.float32)    # fused layer 1: rows 0:H = Q1
    w1f = w1f.at[:H, :in_dim].set(w1a)
    w1f = w1f.at[H:, :in_dim].set(w1b)
    sections = [w1f, blkdiag(w2a, w2b), blkdiag(w3a, w3b), blkdiag(w4a, w4b)]

    C = _round_up(max(INP, H2), 128)           # lane-dense weight slab width
    offs, rows = [], 0
    for s in sections:
        offs.append(rows)
        rows += _round_up(s.shape[0], 8)
    w_slab = jnp.zeros((_round_up(rows, 8), C), w_dtype)
    for off, s in zip(offs, sections):
        w_slab = w_slab.at[off:off + s.shape[0], :s.shape[1]].set(
            s.astype(w_dtype))

    b_rows = _round_up(max(H2, S2), 8)
    b_slab = jnp.zeros((b_rows, 8), jnp.float32)
    b_slab = b_slab.at[:H2, 0].set(jnp.concatenate([b1a, b1b]))
    b_slab = b_slab.at[:H2, 1].set(jnp.concatenate([b2a, b2b]))
    b_slab = b_slab.at[:H2, 2].set(jnp.concatenate([b3a, b3b]))
    b_slab = b_slab.at[:S2, 3].set(jnp.concatenate([b4a, b4b]))

    meta = dict(obs_dim=obs_dim, act_dim=action_dim, in_dim=in_dim, inp=INP,
                t_off=INP, S=S, H2=H2, S2=S2, x_rows=x_rows,
                w_offs=tuple(offs))
    return w_slab, b_slab, meta


# ----------------------------------------------------------------------------
# Wrapper: batch-tiled (on the lane axis), weight-resident pallas_call.
# ----------------------------------------------------------------------------
def _choose_batch_tile(B, tb_req, num_cores):
    # On v7x (2 TensorCores) keep >= num_cores grid steps so the "parallel"
    # batch axis can be sharded across cores; on v5e/v6e a single big step
    # (weights resident, overhead-bound kernel) is best.
    if num_cores > 1 and B > 128 * num_cores:
        tb_req = min(tb_req, max(128, (pl.cdiv(B, num_cores) // 128) * 128))
    if B <= tb_req:
        return _round_up(B, 8)                 # single grid step
    return max(128, (tb_req // 128) * 128)     # multi-step: lane-aligned tile


def critic_sf_dev_forward(obs, action, task, w_slab, b_slab, meta, *,
                          tb=512, num_cores=1):
    B = obs.shape[0]
    assert action.shape[0] == B and task.shape[0] == B
    obs_dim, act_dim, S = meta["obs_dim"], meta["act_dim"], meta["S"]
    inp, t_off, H2, S2 = meta["inp"], meta["t_off"], meta["H2"], meta["S2"]
    x_rows = meta["x_rows"]

    tb = _choose_batch_tile(B, tb, num_cores)
    Bp = _round_up(B, tb)

    # One lane-dense (feature_rows, batch) input slab: batch on lanes, a single
    # unmasked DMA per grid step; padding folded into this one build.
    x = jnp.zeros((x_rows, Bp), jnp.float32)
    x = x.at[0:obs_dim, 0:B].set(obs.T.astype(jnp.float32))
    x = x.at[obs_dim:obs_dim + act_dim, 0:B].set(action.T.astype(jnp.float32))
    x = x.at[t_off:t_off + S, 0:B].set(task.T.astype(jnp.float32))

    kernel = functools.partial(
        _critic_sf_fused_kernel, inp=inp, t_off=t_off, S=S, H2=H2, S2=S2,
        w_offs=meta["w_offs"])

    flops = 2 * Bp * (inp * H2 + 2 * H2 * H2 + H2 * S2 + 2 * S2)
    bytes_accessed = (x.size * x.dtype.itemsize
                      + w_slab.size * w_slab.dtype.itemsize
                      + b_slab.size * b_slab.dtype.itemsize
                      + 2 * Bp * 4)

    out = pl.pallas_call(
        kernel,
        out_shape=jax.ShapeDtypeStruct((2, Bp), jnp.float32),
        grid_spec=pltpu.PrefetchScalarGridSpec(
            num_scalar_prefetch=0,
            grid=(Bp // tb,),
            in_specs=[
                pl.BlockSpec((x_rows, tb), lambda i: (0, i)),
                pl.BlockSpec(w_slab.shape, lambda i: (0, 0)),   # resident
                pl.BlockSpec(b_slab.shape, lambda i: (0, 0)),   # resident
            ],
            out_specs=pl.BlockSpec((2, tb), lambda i: (0, i)),  # lane-dense
        ),
        compiler_params=pltpu.CompilerParams(
            dimension_semantics=("parallel",),
        ),
        cost_estimate=pl.CostEstimate(
            flops=flops, transcendentals=0, bytes_accessed=bytes_accessed),
    )(x, w_slab, b_slab)

    q1 = out[0, :B].reshape(-1, 1)
    q2 = out[1, :B].reshape(-1, 1)
    return q1, q2


# Pure-JAX reference.  mirror_bf16=True mimics the kernel's bf16-at-the-MXU
# (f32 accumulate / bias / ReLU / contraction) so it matches to ~1e-6.
def _reference(obs, action, task, q1_params, q2_params, mirror_bf16=True):
    x = jnp.concatenate([obs, action], axis=-1)
    cast = (lambda a: a.astype(jnp.bfloat16)) if mirror_bf16 else (lambda a: a)

    def mlp4(x, params):
        h = x
        for li, (w, b) in enumerate(params):
            z = jnp.dot(cast(h), cast(w).T,
                        preferred_element_type=jnp.float32) + b
            h = jnp.maximum(z, 0.0) if li < 3 else z
        return h

    q1 = jnp.sum(task * mlp4(x, q1_params), axis=-1, keepdims=True)
    q2 = jnp.sum(task * mlp4(x, q2_params), axis=-1, keepdims=True)
    return q1, q2


if __name__ == "__main__":
    # Shapes implied by forward(): obs (B, obs_dim), action (B, act_dim),
    # task (B, sf_dim). feature_dim is unused by this module's forward.
    B, OBS_DIM, ACT_DIM, HIDDEN_DIM, SF_DIM = 8, 24, 8, 32, 16

    key = jax.random.PRNGKey(0)
    k_obs, k_act, k_task, k_params = jax.random.split(key, 4)

    obs = jax.random.normal(k_obs, (B, OBS_DIM), jnp.float32)
    action = jax.random.normal(k_act, (B, ACT_DIM), jnp.float32)
    task = jax.random.normal(k_task, (B, SF_DIM), jnp.float32)

    q1_params, q2_params = init_params(k_params, OBS_DIM, ACT_DIM,
                                       HIDDEN_DIM, SF_DIM)
    w_slab, b_slab, meta = pack_params(q1_params, q2_params, OBS_DIM, ACT_DIM,
                                       HIDDEN_DIM, SF_DIM,
                                       w_dtype=jnp.bfloat16)

    q1, q2 = critic_sf_dev_forward(obs, action, task, w_slab, b_slab, meta)
    jax.block_until_ready((q1, q2))
    assert q1.shape == (B, 1) and q2.shape == (B, 1)

    # Tight check against the bf16-mirrored reference (same MXU numerics).
    r1, r2 = _reference(obs, action, task, q1_params, q2_params,
                        mirror_bf16=True)
    assert jnp.allclose(q1, r1, atol=1e-4, rtol=1e-4), \
        float(jnp.max(jnp.abs(q1 - r1)))
    assert jnp.allclose(q2, r2, atol=1e-4, rtol=1e-4), \
        float(jnp.max(jnp.abs(q2 - r2)))

    # Diagnostic only: deviation from full-f32 math (bf16 MXU rounding).
    f1, f2 = _reference(obs, action, task, q1_params, q2_params,
                        mirror_bf16=False)
    err = float(jnp.max(jnp.maximum(jnp.abs(q1 - f1), jnp.abs(q2 - f2))))
    print(f"max |bf16 - f32| deviation: {err:.3e}")

    print("KERNEL_OK")
</pallas_src>

<mosaic_0001>
module attributes {stable_mosaic.version = 11 : i64} {
  func.func @_critic_sf_fused_kernel(%arg0: i32, %arg1: memref<48x8xf32, #tpu.memory_space<vmem>>, %arg2: memref<224x128xbf16, #tpu.memory_space<vmem>>, %arg3: memref<64x8xf32, #tpu.memory_space<vmem>>, %arg4: memref<2x8xf32, #tpu.memory_space<vmem>>) attributes {dimension_semantics = [#tpu.dimension_semantics<parallel>], iteration_bounds = array<i64: 1>, scalar_prefetch = 0 : i64, scratch_operands = 0 : i64, tpu.core_type = #tpu.core_type<tc>, window_params = [{transform_indices = @transform_0, window_bounds = array<i64: 48, 8>}, {pipeline_mode = #tpu.pipeline_mode<synchronous>, transform_indices = @transform_1, window_bounds = array<i64: 224, 128>}, {pipeline_mode = #tpu.pipeline_mode<synchronous>, transform_indices = @transform_2, window_bounds = array<i64: 64, 8>}, {transform_indices = @transform_3, window_bounds = array<i64: 2, 8>}]} {
    %c0 = arith.constant 0 : index
    %c0_0 = arith.constant 0 : index
    %0 = vector.load %arg1[%c0, %c0_0] : memref<48x8xf32, #tpu.memory_space<vmem>>, vector<32x8xf32>
    %c32 = arith.constant 32 : index
    %c0_1 = arith.constant 0 : index
    %1 = vector.load %arg1[%c32, %c0_1] : memref<48x8xf32, #tpu.memory_space<vmem>>, vector<16x8xf32>
    %c0_2 = arith.constant 0 : index
    %c0_3 = arith.constant 0 : index
    %2 = vector.load %arg2[%c0_2, %c0_3] : memref<224x128xbf16, #tpu.memory_space<vmem>>, vector<64x32xbf16>
    %c64 = arith.constant 64 : index
    %c0_4 = arith.constant 0 : index
    %3 = vector.load %arg2[%c64, %c0_4] : memref<224x128xbf16, #tpu.memory_space<vmem>>, vector<64x64xbf16>
    %c128 = arith.constant 128 : index
    %c0_5 = arith.constant 0 : index
    %4 = vector.load %arg2[%c128, %c0_5] : memref<224x128xbf16, #tpu.memory_space<vmem>>, vector<64x64xbf16>
    %c192 = arith.constant 192 : index
    %c0_6 = arith.constant 0 : index
    %5 = vector.load %arg2[%c192, %c0_6] : memref<224x128xbf16, #tpu.memory_space<vmem>>, vector<32x64xbf16>
    %c0_7 = arith.constant 0 : index
    %c0_8 = arith.constant 0 : index
    %6 = vector.load %arg3[%c0_7, %c0_8] : memref<64x8xf32, #tpu.memory_space<vmem>>, vector<64x1xf32>
    %c0_9 = arith.constant 0 : index
    %c1 = arith.constant 1 : index
    %7 = vector.load %arg3[%c0_9, %c1] : memref<64x8xf32, #tpu.memory_space<vmem>>, vector<64x1xf32>
    %c0_10 = arith.constant 0 : index
    %c2 = arith.constant 2 : index
    %8 = vector.load %arg3[%c0_10, %c2] : memref<64x8xf32, #tpu.memory_space<vmem>>, vector<64x1xf32>
    %c0_11 = arith.constant 0 : index
    %c3 = arith.constant 3 : index
    %9 = vector.load %arg3[%c0_11, %c3] : memref<64x8xf32, #tpu.memory_space<vmem>>, vector<32x1xf32>
    %10 = arith.truncf %0 : vector<32x8xf32> to vector<32x8xbf16>
    %cst = arith.constant dense<0.000000e+00> : vector<64x8xf32>
    %11 = tpu.matmul %2, %10, %cst {dimension_numbers = #tpu.dot_dimension_numbers<[1], [0], [0], [1], [0, 0, 1, 1], [], []>} : vector<64x32xbf16>, vector<32x8xbf16>, vector<64x8xf32> -> vector<64x8xf32>
    %12 = vector.broadcast %6 : vector<64x1xf32> to vector<64x8xf32>
    %13 = arith.addf %11, %12 : vector<64x8xf32>
    %cst_12 = arith.constant 0.000000e+00 : f32
    %14 = vector.broadcast %cst_12 : f32 to vector<64x8xf32>
    %15 = arith.maximumf %13, %14 : vector<64x8xf32>
    %16 = arith.truncf %15 : vector<64x8xf32> to vector<64x8xbf16>
    %cst_13 = arith.constant dense<0.000000e+00> : vector<64x8xf32>
    %17 = tpu.matmul %3, %16, %cst_13 {dimension_numbers = #tpu.dot_dimension_numbers<[1], [0], [0], [1], [0, 0, 1, 1], [], []>} : vector<64x64xbf16>, vector<64x8xbf16>, vector<64x8xf32> -> vector<64x8xf32>
    %18 = vector.broadcast %7 : vector<64x1xf32> to vector<64x8xf32>
    %19 = arith.addf %17, %18 : vector<64x8xf32>
    %cst_14 = arith.constant 0.000000e+00 : f32
    %20 = vector.broadcast %cst_14 : f32 to vector<64x8xf32>
    %21 = arith.maximumf %19, %20 : vector<64x8xf32>
    %22 = arith.truncf %21 : vector<64x8xf32> to vector<64x8xbf16>
    %cst_15 = arith.constant dense<0.000000e+00> : vector<64x8xf32>
    %23 = tpu.matmul %4, %22, %cst_15 {dimension_numbers = #tpu.dot_dimension_numbers<[1], [0], [0], [1], [0, 0, 1, 1], [], []>} : vector<64x64xbf16>, vector<64x8xbf16>, vector<64x8xf32> -> vector<64x8xf32>
    %24 = vector.broadcast %8 : vector<64x1xf32> to vector<64x8xf32>
    %25 = arith.addf %23, %24 : vector<64x8xf32>
    %cst_16 = arith.constant 0.000000e+00 : f32
    %26 = vector.broadcast %cst_16 : f32 to vector<64x8xf32>
    %27 = arith.maximumf %25, %26 : vector<64x8xf32>
    %28 = arith.truncf %27 : vector<64x8xf32> to vector<64x8xbf16>
    %cst_17 = arith.constant dense<0.000000e+00> : vector<32x8xf32>
    %29 = tpu.matmul %5, %28, %cst_17 {dimension_numbers = #tpu.dot_dimension_numbers<[1], [0], [0], [1], [0, 0, 1, 1], [], []>} : vector<32x64xbf16>, vector<64x8xbf16>, vector<32x8xf32> -> vector<32x8xf32>
    %30 = vector.broadcast %9 : vector<32x1xf32> to vector<32x8xf32>
    %31 = arith.addf %29, %30 : vector<32x8xf32>
    %32 = vector.extract_strided_slice %31 {offsets = [0, 0], sizes = [16, 8], strides = [1, 1]} : vector<32x8xf32> to vector<16x8xf32>
    %33 = arith.mulf %1, %32 : vector<16x8xf32>
    %cst_18 = arith.constant dense<0.000000e+00> : vector<8xf32>
    %34 = vector.multi_reduction <add>, %33, %cst_18 [0] : vector<16x8xf32> to vector<8xf32>
    %35 = vector.shape_cast %34 : vector<8xf32> to vector<1x8xf32>
    %36 = vector.extract_strided_slice %31 {offsets = [16, 0], sizes = [16, 8], strides = [1, 1]} : vector<32x8xf32> to vector<16x8xf32>
    %37 = arith.mulf %1, %36 : vector<16x8xf32>
    %cst_19 = arith.constant dense<0.000000e+00> : vector<8xf32>
    %38 = vector.multi_reduction <add>, %37, %cst_19 [0] : vector<16x8xf32> to vector<8xf32>
    %39 = vector.shape_cast %38 : vector<8xf32> to vector<1x8xf32>
    %40 = tpu.concatenate %35, %39 in 0 : vector<1x8xf32>, vector<1x8xf32> -> vector<2x8xf32>
    %c0_20 = arith.constant 0 : index
    %c0_21 = arith.constant 0 : index
    %41 = vector.load %arg4[%c0_20, %c0_21] : memref<2x8xf32, #tpu.memory_space<vmem>>, vector<2x8xf32>
    tpu.vector_store %arg4[%c0_20, %c0_21], %40 {strides = array<i32>} : memref<2x8xf32, #tpu.memory_space<vmem>>, vector<2x8xf32>,
    return
  }
  func.func @transform_0(%arg0: i32) -> (i32, i32) {
    %c0_i32 = arith.constant 0 : i32
    %c0_i32_0 = arith.constant 0 : i32
    return %c0_i32, %arg0 : i32, i32
  }
  func.func @transform_1(%arg0: i32) -> (i32, i32) {
    %c0_i32 = arith.constant 0 : i32
    %c0_i32_0 = arith.constant 0 : i32
    %c0_i32_1 = arith.constant 0 : i32
    return %c0_i32, %c0_i32_0 : i32, i32
  }
  func.func @transform_2(%arg0: i32) -> (i32, i32) {
    %c0_i32 = arith.constant 0 : i32
    %c0_i32_0 = arith.constant 0 : i32
    %c0_i32_1 = arith.constant 0 : i32
    return %c0_i32, %c0_i32_0 : i32, i32
  }
  func.func @transform_3(%arg0: i32) -> (i32, i32) {
    %c0_i32 = arith.constant 0 : i32
    %c0_i32_0 = arith.constant 0 : i32
    return %c0_i32, %arg0 : i32, i32
  }
}

</mosaic_0001>

<bundles_post_ra>
// kernel: tpu_custom_call.1
= control target key start
LH: loop header
LB: loop body
LE: loop exit
PB: predicated region body
PF: predicated region fallthrough
CT: control target
= control target key end

     0   :  { %vm120_vm0 = vcmask 261120   ;;  %v778_v5 = vmov 0   ;;  %s957_s0 = inlined_call_operand.vmem [shape: f32[48,8], index: 0, kind: input, shape index: {}]   ;;  %s958_s1 = inlined_call_operand.vmem [shape: bf16[224,128], index: 1, kind: input, shape index: {}]   ;;  %s959_s2 = inlined_call_operand.vmem [shape: f32[64,8], index: 2, kind: input, shape index: {}]   ;;  %s960_s3 = inlined_call_operand.hbm [shape: f32[2,8], index: 3, kind: output, shape index: {}]  }
   0x1   :  { %v16_v0 = vld [vmem:[%s957_s0] sm:$0xff]  ;;  %v17_v1 = vld [vmem:[%s957_s0 + $0x8] sm:$0xff]  ;;  %v18_v2 = vld [vmem:[%s957_s0 + $0x10] sm:$0xff]  ;;  %732 = vset.pattern.permute.xlu0 %v778_v5  ;;  %733 = vset.pattern.permute.xlu1 %v778_v5 }
   0x2   :  { %v58_v3 = vpack.c.bf16 %v17_v1, %v16_v0  ;;  %v19_v4 = vld [vmem:[%s957_s0 + $0x18] sm:$0xff]  ;;  %v740_v7 = vld [vmem:[%s958_s1] sm:$0xff]   ;;  %v827_v9 = vld [vmem:[%s959_s2 + $0x10] sm:$0xff] }
   0x3   :  { %v59_v6 = vpack.c.bf16 %v19_v4, %v18_v2  ;;  %675 = vmatprep.mubr.msk.bf16.mxu0 %vm120_vm0, %v740_v7  ;;  %v822_v8 = vld [vmem:[%s959_s2] sm:$0xff]  ;;  %v741_v10 = vld [vmem:[%s958_s1 + $0x8] sm:$0xff]   ;;  %72 = vperm.xlu1 %733, %v827_v9   ;;  %v742_v11 = vld [vmem:[%s958_s1 + $0x10] sm:$0xff]  }
   0x4   :  { %671 = vmatprep.subr.bf16.mxu0 %v58_v3  ;;  %62 = vperm.xlu0 %732, %v822_v8   ;;  %v840_v12 = vld [vmem:[%s959_s2 + $0x8] sm:$0xff]  ;;  %v845_v13 = vld [vmem:[%s959_s2 + $0x18] sm:$0xff]  ;;  %v850_v14 = vld [vmem:[%s959_s2 + $0x20] sm:$0xff] }
   0x5   :  { %672 = vmatpush3.bf16.msra.mxu0 %v58_v3  ;;  %v855_v15 = vld [vmem:[%s959_s2 + $0x28] sm:$0xff] }
   0x6   :  { %673 = vmatprep.subr.bf16.mxu0 %v59_v6 }
   0x7   :  { %77 = vperm.xlu1 %733, %v845_v13  }
   0x8   :  { %67 = vperm.xlu0 %732, %v840_v12  }
   0x9   :  { %674 = vmatpush3.bf16.msra.mxu0 %v59_v6 }
   0xb   :  { %87 = vperm.xlu1 %733, %v855_v15  }
   0xc   :  { %676 = vmatmul.mubr.msk.bf16.vlgmr.msra.gmra.mrb[0].mxu0 %vm120_vm0, %v741_v10  ;;  %82 = vperm.xlu0 %732, %v850_v14  }
   0xd   :  { %679 = vmatprep.mubr.msk.bf16.mxu0 %vm120_vm0, %v742_v11 }
   0xe   :  { %8 = vsyncpa [#allocation3], 0  ;;  %v743_v16 = vld [vmem:[%s958_s1 + $0x18] sm:$0xff]   ;;  %v869_v17 = vld [vmem:[%s959_s2 + $0x30] sm:$0xff]  ;;  %vm262_vm1 = vcmask 523264   ;;  %v779_v20 = vmov 1  }
   0xf   :  { %v874_v18 = vld [vmem:[%s959_s2 + $0x38] sm:$0xff]  ;;  %v744_v19 = vld [vmem:[%s958_s1 + $0x20] sm:$0xff]   ;;  %v745_v57 = vld [vmem:[%s958_s1 + $0x28] sm:$0xff]   ;;  %v780_v61 = vmov 2   ;;  %vm576_vm2 = vcmask 64512   ;;  %vm597_vm3 = vcmask 1040384  }
  0x10   :  { %92 = vperm.xlu0 %732, %v869_v17   ;;  %97 = vperm.xlu1 %733, %v874_v18   ;;  %v746_v58 = vld [vmem:[%s958_s1 + $0x30] sm:$0xff]   ;;  %v747_v59 = vld [vmem:[%s958_s1 + $0x38] sm:$0xff]   ;;  %v748_v60 = vld [vmem:[%s958_s1 + $0x40] sm:$0xff]   ;;  %vm599_vm4 = vcmask 58368  }
  0x11   :  { %691 = vmatprep.mubr.msk.bf16.mxu1 %vm262_vm1, %v744_v19 }
  0x14   :  { %680 = vmatmul.mubr.msk.bf16.gmra.mrb[4].mxu0 %vm120_vm0, %v743_v16  ;;  %735 = vset.pattern.permute.xlu1 %v779_v20 }
  0x15   :  { %734 = vset.pattern.permute.xlu0 %v779_v20  ;;  %215 = vperm.xlu1 %735, %v840_v12  }
  0x16   :  { %211 = vperm.xlu0 %734, %v822_v8   ;;  %707 = vmatprep.mubr.msk.bf16.mxu0 %vm262_vm1, %v748_v60 }
  0x19   :  { %219 = vperm.xlu1 %735, %v827_v9  }
  0x1a   :  { %223 = vperm.xlu0 %734, %v845_v13  }
  0x1d   :  { %227 = vperm.xlu1 %735, %v850_v14  }
  0x1e   :  { %231 = vperm.xlu0 %734, %v855_v15  }
  0x21   :  { %235 = vperm.xlu1 %735, %v869_v17  }
  0x22   :  { %239 = vperm.xlu0 %734, %v874_v18  }
  0x25   :  { %736 = vset.pattern.permute.xlu1 %v780_v61 }
  0x26   :  { %737 = vset.pattern.permute.xlu0 %v780_v61  ;;  %353 = vperm.xlu1 %736, %v822_v8  }
  0x27   :  { %357 = vperm.xlu0 %737, %v840_v12  }
  0x2a   :  { %361 = vperm.xlu1 %736, %v827_v9  }
  0x2b   :  { %369 = vperm.xlu0 %737, %v850_v14  }
  0x2e   :  { %365 = vperm.xlu1 %736, %v845_v13  }
  0x2f   :  { %377 = vperm.xlu0 %737, %v869_v17  }
  0x32   :  { %373 = vperm.xlu1 %736, %v855_v15  }
  0x36   :  { %381 = vperm.xlu1 %736, %v874_v18  }
  0x82   :  { %v73_v22 = vpop.permute.xlu1 %72 }
  0x83   :  { %v63_v21 = vpop.permute.xlu0 %62 }
  0x86   :  { %v78_v24 = vpop.permute.xlu1 %77 }
  0x87   :  { %v68_v23 = vpop.permute.xlu0 %67 }
  0x8a   :  { %v88_v33 = vpop.permute.xlu1 %87 }
  0x8b   :  { %v83_v28 = vpop.permute.xlu0 %82 }
  0x8f   :  { %v93_v40 = vpop.permute.xlu0 %92  ;;  %v98_v45 = vpop.permute.xlu1 %97 }
  0x94   :  { %v216_v62 = vpop.permute.xlu1 %215 }
  0x95   :  { %v212_v63 = vpop.permute.xlu0 %211 }
  0x98   :  { %v220_v0 = vpop.permute.xlu1 %219 }
  0x99   :  { %v224_v1 = vpop.permute.xlu0 %223 }
  0x9c   :  { %v228_v5 = vpop.permute.xlu1 %227 }
  0x9d   :  { %v232_v14 = vpop.permute.xlu0 %231 }
  0xa0   :  { %v236_v18 = vpop.permute.xlu1 %235 }
  0xdf   :  { %v677_v25 = vpop.f32.mrb[0].mxu0 }
  0xe0   :  { %v176_v26 = vadd.f32 %v677_v25, %v73_v22  ;;  %v167_v27 = vpop.f32.mrb[1].mxu0 }
  0xe1   :  { %v168_v29 = vadd.f32 %v167_v27, %v63_v21  ;;  %v678_v30 = vpop.f32.mrb[2].mxu0 }
  0xe2   :  { %v179_v31 = vadd.f32 %v678_v30, %v78_v24  ;;  %v170_v32 = vpop.f32.mrb[3].mxu0  ;;  %v200_v35 = vmax.f32 %v176_v26, 0.0  ;;  %v240_v26 = vpop.permute.xlu0 %239 }
  0xe3   :  { %v171_v34 = vadd.f32 %v170_v32, %v68_v23  ;;  %v198_v37 = vmax.f32 %v168_v29, 0.0 }
  0xe4   :  { %v201_v36 = vmax.f32 %v179_v31, 0.0 }
  0xe5   :  { %v199_v38 = vmax.f32 %v171_v34, 0.0 }
  0xe6   :  { %v207_v39 = vpack.c.bf16 %v201_v36, %v200_v35 }
  0xe7   :  { %v681_v41 = vpop.f32.mrb[4].mxu0  ;;  %v206_v42 = vpack.c.bf16 %v199_v38, %v198_v37  ;;  %v749_v38 = vld [vmem:[%s958_s1 + $0x48] sm:$0xff]  }
  0xe8   :  { %v192_v43 = vadd.f32 %v681_v41, %v93_v40  ;;  %v183_v44 = vpop.f32.mrb[5].mxu0  ;;  %v751_v40 = vld [vmem:[%s958_s1 + $0x58] sm:$0xff]   ;;  %v752_v41 = vld [vmem:[%s958_s1 + $0x60] sm:$0xff]  }
  0xe9   :  { %v184_v46 = vadd.f32 %v183_v44, %v83_v28  ;;  %v682_v47 = vpop.f32.mrb[6].mxu0  ;;  %683 = vmatprep.subr.bf16.mxu1 %v206_v42 }
  0xea   :  { %v195_v48 = vadd.f32 %v682_v47, %v98_v45  ;;  %v186_v49 = vpop.f32.mrb[7].mxu0  ;;  %684 = vmatpush3.bf16.msra.mxu1 %v206_v42  ;;  %v204_v51 = vmax.f32 %v192_v43, 0.0  ;;  %v781_v42 = vmov 3   ;;  %v354_v43 = vpop.permute.xlu1 %353 }
  0xeb   :  { %v187_v50 = vadd.f32 %v186_v49, %v88_v33  ;;  %685 = vmatprep.subr.bf16.mxu1 %v207_v39  ;;  %v202_v53 = vmax.f32 %v184_v46, 0.0  ;;  %739 = vset.pattern.permute.xlu1 %v781_v42  ;;  %v358_v45 = vpop.permute.xlu0 %357 }
  0xec   :  { %v205_v52 = vmax.f32 %v195_v48, 0.0  ;;  %738 = vset.pattern.permute.xlu0 %v781_v42  ;;  %498 = vperm.xlu1 %739, %v840_v12  }
  0xed   :  { %v203_v54 = vmax.f32 %v187_v50, 0.0  ;;  %494 = vperm.xlu0 %738, %v822_v8  }
  0xee   :  { %v209_v55 = vpack.c.bf16 %v205_v52, %v204_v51  ;;  %686 = vmatpush3.bf16.msra.mxu1 %v207_v39  ;;  %v750_v39 = vld [vmem:[%s958_s1 + $0x50] sm:$0xff]   ;;  %v362_v44 = vpop.permute.xlu1 %361 }
  0xef   :  { %v208_v56 = vpack.c.bf16 %v203_v54, %v202_v53  ;;  %v370_v50 = vpop.permute.xlu0 %369 }
  0xf0   :  { %502 = vperm.xlu1 %739, %v827_v9  }
  0xf1   :  { %687 = vmatprep.subr.bf16.mxu1 %v208_v56  ;;  %506 = vperm.xlu0 %738, %v845_v13  }
  0xf2   :  { %688 = vmatpush3.bf16.msra.mxu1 %v208_v56  ;;  %v366_v46 = vpop.permute.xlu1 %365 }
  0xf3   :  { %689 = vmatprep.subr.bf16.mxu1 %v209_v55  ;;  %v378_v13 = vpop.permute.xlu0 %377 }
  0xf6   :  { %690 = vmatpush3.bf16.msra.mxu1 %v209_v55  ;;  %v374_v55 = vpop.permute.xlu1 %373 }
  0xf9   :  { %692 = vmatmul.mubr.msk.bf16.vlgmr.msra.gmra.mrb[0].mxu1 %vm262_vm1, %v745_v57 }
  0xfa   :  { %695 = vmatprep.mubr.msk.bf16.mxu1 %vm262_vm1, %v746_v58 }
 0x101   :  { %696 = vmatmul.mubr.msk.bf16.gmra.mrb[4].mxu1 %vm262_vm1, %v747_v59 }
 0x102   :  { %723 = vmatprep.mubr.msk.bf16.mxu1 %vm262_vm1, %v752_v41 }
 0x1cc   :  { %v693_v2 = vpop.f32.mrb[0].mxu1 }
 0x1cd   :  { %v318_v3 = vadd.f32 %v693_v2, %v220_v0  ;;  %v309_v4 = vpop.f32.mrb[1].mxu1 }
 0x1ce   :  { %v310_v6 = vadd.f32 %v309_v4, %v212_v63  ;;  %v694_v7 = vpop.f32.mrb[2].mxu1  ;;  %v382_v63 = vpop.permute.xlu1 %381 }
 0x1cf   :  { %v321_v10 = vadd.f32 %v694_v7, %v224_v1  ;;  %v312_v11 = vpop.f32.mrb[3].mxu1  ;;  %v342_v19 = vmax.f32 %v318_v3, 0.0 }
 0x1d0   :  { %v313_v16 = vadd.f32 %v312_v11, %v216_v62  ;;  %v340_v20 = vmax.f32 %v310_v6, 0.0 }
 0x1d1   :  { %v343_v17 = vmax.f32 %v321_v10, 0.0 }
 0x1d2   :  { %v341_v15 = vmax.f32 %v313_v16, 0.0  ;;  %v753_v16 = vld [vmem:[%s958_s1 + $0x68] sm:$0xff]  }
 0x1d3   :  { %v349_v21 = vpack.c.bf16 %v343_v17, %v342_v19  ;;  %v499_v19 = vpop.permute.xlu1 %498  ;;  %v495_v17 = vpop.permute.xlu0 %494 }
 0x1d4   :  { %v348_v22 = vpack.c.bf16 %v341_v15, %v340_v20  ;;  %v697_v23 = vpop.f32.mrb[4].mxu1  ;;  %v20_v15 = vld [vmem:[%s957_s0 + $0x20] sm:$0xff] }
 0x1d5   :  { %v334_v24 = vadd.f32 %v697_v23, %v236_v18  ;;  %v325_v25 = vpop.f32.mrb[5].mxu1 }
 0x1d6   :  { %v326_v27 = vadd.f32 %v325_v25, %v228_v5  ;;  %v698_v28 = vpop.f32.mrb[6].mxu1  ;;  %699 = vmatprep.subr.bf16.mxu0 %v348_v22  ;;  %v21_v25 = vld [vmem:[%s957_s0 + $0x28] sm:$0xff]  ;;  %s782_s0 = smov [#allocation2]  }
 0x1d7   :  { %v337_v29 = vadd.f32 %v698_v28, %v240_v26  ;;  %v328_v30 = vpop.f32.mrb[7].mxu1  ;;  %700 = vmatpush3.bf16.msra.mxu0 %v348_v22  ;;  %v346_v32 = vmax.f32 %v334_v24, 0.0  ;;  %v503_v20 = vpop.permute.xlu1 %502  ;;  %s607_s1 = sshll.u32 %s782_s0, 4  ;;  %s608_s1 = int_to_ptr.vmem [resolvable:$true] %s607_s1 }
 0x1d8   :  { %v329_v31 = vadd.f32 %v328_v30, %v232_v14  ;;  %701 = vmatprep.subr.bf16.mxu0 %v349_v21  ;;  %v344_v34 = vmax.f32 %v326_v27, 0.0  ;;  %v507_v23 = vpop.permute.xlu0 %506  ;;  %s754_s13 = scalar_lea.vmem %s608_s1, 32  ;;  %p759_p1 = scmp.lt.s32.totalorder %s608_s1, %s608_s1 }
 0x1d9   :  { %v347_v33 = vmax.f32 %v337_v29, 0.0  ;;  %p755_p0 = scmp.ne.s32.totalorder %s608_s1, %s754_s13  ;;  %p760_p2 = scmp.lt.s32.totalorder %s754_s13, %s754_s13 }
 0x1da   :  { %v345_v35 = vmax.f32 %v329_v31, 0.0 }
 0x1db   :  { %v351_v36 = vpack.c.bf16 %v347_v33, %v346_v32  ;;  %702 = vmatpush3.bf16.msra.mxu0 %v349_v21  ;;  %p761_p3 = por %p760_p2, %p759_p1 }
 0x1dc   :  { %v350_v37 = vpack.c.bf16 %v345_v35, %v344_v34 }
 0x1dd   :  { %p762_p4 = pnand %p761_p3, %p755_p0 }
 0x1de   :  { %703 = vmatprep.subr.bf16.mxu0 %v350_v37 }
 0x1df   :  { %704 = vmatpush3.bf16.msra.mxu0 %v350_v37 }
 0x1e0   :  { %705 = vmatprep.subr.bf16.mxu0 %v351_v36 }
 0x1e3   :  { %706 = vmatpush3.bf16.msra.mxu0 %v351_v36 }
 0x1e6   :  { %708 = vmatmul.mubr.msk.bf16.vlgmr.msra.gmra.mrb[8].mxu0 %vm262_vm1, %v749_v38 }
 0x1e7   :  { %711 = vmatprep.mubr.msk.bf16.mxu0 %vm262_vm1, %v750_v39 }
 0x1ee   :  { %712 = vmatmul.mubr.msk.bf16.gmra.mrb[12].mxu0 %vm262_vm1, %v751_v40 }
 0x2b9   :  { %v709_v47 = vpop.f32.mrb[8].mxu0 }
 0x2ba   :  { %v459_v48 = vadd.f32 %v709_v47, %v362_v44  ;;  %v450_v49 = vpop.f32.mrb[9].mxu0 }
 0x2bb   :  { %v451_v51 = vadd.f32 %v450_v49, %v354_v43  ;;  %v710_v52 = vpop.f32.mrb[10].mxu0 }
 0x2bc   :  { %v462_v53 = vadd.f32 %v710_v52, %v366_v46  ;;  %v453_v54 = vpop.f32.mrb[11].mxu0  ;;  %v483_v56 = vmax.f32 %v459_v48, 0.0 }
 0x2bd   :  { %v454_v12 = vadd.f32 %v453_v54, %v358_v45  ;;  %v481_v57 = vmax.f32 %v451_v51, 0.0 }
 0x2be   :  { %v484_v8 = vmax.f32 %v462_v53, 0.0 }
 0x2bf   :  { %v482_v9 = vmax.f32 %v454_v12, 0.0 }
 0x2c0   :  { %v490_v58 = vpack.c.bf16 %v484_v8, %v483_v56 }
 0x2c1   :  { %v489_v59 = vpack.c.bf16 %v482_v9, %v481_v57  ;;  %v713_v60 = vpop.f32.mrb[12].mxu0 }
 0x2c2   :  { %v475_v61 = vadd.f32 %v713_v60, %v378_v13  ;;  %v466_v62 = vpop.f32.mrb[13].mxu0 }
 0x2c3   :  { %v467_v0 = vadd.f32 %v466_v62, %v370_v50  ;;  %v714_v1 = vpop.f32.mrb[14].mxu0  ;;  %715 = vmatprep.subr.bf16.mxu1 %v489_v59 }
 0x2c4   :  { %v478_v2 = vadd.f32 %v714_v1, %v382_v63  ;;  %v469_v3 = vpop.f32.mrb[15].mxu0  ;;  %716 = vmatpush3.bf16.msra.mxu1 %v489_v59  ;;  %v487_v5 = vmax.f32 %v475_v61, 0.0 }
 0x2c5   :  { %v470_v4 = vadd.f32 %v469_v3, %v374_v55  ;;  %717 = vmatprep.subr.bf16.mxu1 %v490_v58  ;;  %v485_v7 = vmax.f32 %v467_v0, 0.0 }
 0x2c6   :  { %v488_v6 = vmax.f32 %v478_v2, 0.0 }
 0x2c7   :  { %v486_v10 = vmax.f32 %v470_v4, 0.0 }
 0x2c8   :  { %v492_v11 = vpack.c.bf16 %v488_v6, %v487_v5  ;;  %718 = vmatpush3.bf16.msra.mxu1 %v490_v58 }
 0x2c9   :  { %v491_v14 = vpack.c.bf16 %v486_v10, %v485_v7 }
 0x2cb   :  { %719 = vmatprep.subr.bf16.mxu1 %v491_v14 }
 0x2cc   :  { %720 = vmatpush3.bf16.msra.mxu1 %v491_v14 }
 0x2cd   :  { %721 = vmatprep.subr.bf16.mxu1 %v492_v11 }
 0x2d0   :  { %722 = vmatpush3.bf16.msra.mxu1 %v492_v11 }
 0x2d3   :  { %724 = vmatmul.mubr.msk.bf16.vlgmr.msra.gmra.mrb[8].mxu1 %vm262_vm1, %v753_v16 }
 0x3a6   :  { %v725_v21 = vpop.f32.mrb[8].mxu1 }
 0x3a7   :  { %v568_v18 = vadd.f32 %v725_v21, %v503_v20  ;;  %v559_v22 = vpop.f32.mrb[9].mxu1 }
 0x3a8   :  { %v560_v24 = vadd.f32 %v559_v22, %v495_v17  ;;  %v726_v26 = vpop.f32.mrb[10].mxu1 }
 0x3a9   :  { %v586_v27 = vmul.f32 %v568_v18, %v20_v15  ;;  %v571_v28 = vadd.f32 %v726_v26, %v507_v23  ;;  %v562_v29 = vpop.f32.mrb[11].mxu1 }
 0x3aa   :  { %v574_v30 = vmul.f32 %v560_v24, %v20_v15  ;;  %v563_v31 = vadd.f32 %v562_v29, %v499_v19 }
 0x3ab   :  { %v587_v32 = vmul.f32 %v571_v28, %v21_v25  ;;  %v588_v34 = vsel %vm576_vm2, %v586_v27, 0.0 }
 0x3ac   :  { %v575_v33 = vmul.f32 %v563_v31, %v21_v25  ;;  %v577_v36 = vsel %vm576_vm2, %v574_v30, 0.0 }
 0x3ad   :  { %v589_v35 = vsel %vm576_vm2, %v587_v32, 0.0 }
 0x3ae   :  { %v590_v37 = vadd.f32 %v589_v35, %v588_v34  ;;  %v578_v38 = vsel %vm576_vm2, %v575_v33, 0.0 }
 0x3af   :  { %v579_v39 = vadd.f32 %v578_v38, %v577_v36 }
 0x3b0   :  { %v591_v40 = vrot.slane %v590_v37, 4 }
 0x3b1   :  { %v580_v41 = vrot.slane %v579_v39, 4 }
 0x3b2   :  { %v592_v42 = vadd.f32 %v591_v40, %v590_v37 }
 0x3b3   :  { %v581_v43 = vadd.f32 %v580_v41, %v579_v39 }
 0x3b4   :  { %v593_v44 = vrot.slane %v592_v42, 2 }
 0x3b5   :  { %v582_v45 = vrot.slane %v581_v43, 2 }
 0x3b6   :  { %v594_v46 = vadd.f32 %v593_v44, %v592_v42 }
 0x3b7   :  { %v583_v47 = vadd.f32 %v582_v45, %v581_v43 }
 0x3b8   :  { %v595_v48 = vrot.slane %v594_v46, 1 }
 0x3b9   :  { %v584_v49 = vrot.slane %v583_v47, 1 }
 0x3ba   :  { %v596_v50 = vadd.f32 %v595_v48, %v594_v46 }
 0x3bb   :  { %v585_v51 = vadd.f32 %v584_v49, %v583_v47 }
 0x3bd   :  { %v598_v52 = vsel %vm597_vm3, %v585_v51, %v596_v50 }
 0x3be   :  { %600 = vst.msk [vmem:[#allocation2] sm:$0x3] %vm599_vm4, %v598_v52 }
 0x3bf   :  { %765 = shalt.err (!%p762_p4)
}
 0x3c0   :  { %s766_s16 = scalar_lea.hbm %s960_s3, 32 }
 0x3c1   :  { %p767_p5 = scmp.ne.s32.totalorder %s960_s3, %s766_s16  ;;  %p770_p6 = scmp.lt.u32.totalorder %s766_s16, %s960_s3 }
 0x3c3   :  { %p772_p7 = pnand %p770_p6, %p767_p5 }
 0x3c5   :  { %775 = shalt.err (!%p772_p7)
}
 0x3c6   :  { %610 = dma.vmem_to_hbm [thread:$0]  %s608_s1, 32, %s960_s3, [#allocation3]  }
 0x3c7   :  { %776 = dma.done.wait [#allocation3], 32  }
 0x3c8   :  { %777 = vsyncadd [#allocation3], 4294967264 }
 0x3c9   :  { %614 = vsyncpa [#allocation3], 1 }

</bundles_post_ra>
